<compile_context>
chip_gen: v7x
topology: tpu7x:2x2x1
jax: 0.10.0
libtpu: 0.0.40
codegen_flags: <defaults>
</compile_context>

<pallas_src>
import functools

import jax
import jax.numpy as jnp
from jax import lax
from jax.experimental import pallas as pl
from jax.experimental.pallas import tpu as pltpu

LANES = 128


def _round_up(x, m):
    return (x + m - 1) // m * m


# ---------------------------------------------------------------------------
# pltpu.roll direction probe (one tiny kernel, cached).  The conv/pool code only
# ever needs a LEFT rotation (result[..., i] == x[..., i + d]); probing the sign
# once makes the kernels robust to either rotation convention.
# ---------------------------------------------------------------------------

@functools.lru_cache(maxsize=None)
def _roll_is_like_jnp():
    def kernel(x_ref, o_ref):
        o_ref[...] = pltpu.roll(x_ref[...], 3, axis=1)

    x = jnp.tile(jnp.arange(LANES, dtype=jnp.float32)[None, :], (8, 1))
    out = pl.pallas_call(
        kernel, out_shape=jax.ShapeDtypeStruct((8, LANES), jnp.float32))(x)
    return bool(jnp.array_equal(out, jnp.roll(x, 3, axis=1)))


def _roll_left(x, d, size):
    """result[..., i] == x[..., (i + d) % size] along the last (lane) axis."""
    d = d % size
    if d == 0:
        return x
    amt = (size - d) if _roll_is_like_jnp() else d
    return pltpu.roll(x, amt, axis=1)


# ---------------------------------------------------------------------------
# Fused Conv2d(valid, stride 1) + bias + ReLU (+ optional MaxPool2d) kernel.
# Grid: (N,).  Whole (C, Hp, 128) image block in VMEM; weights/bias in SMEM and
# read as scalars (scalar x vector VPU FMAs).  H is processed in bands so all OC
# accumulators stay resident in vregs.
# ---------------------------------------------------------------------------

def _conv_relu_pool_kernel(w_ref, b_ref, x_ref, o_ref, scr_ref, *,
                           C, OC, KH, KW, L, pk, ps, Pb, n_bands, Hp_in,
                           PH, PW, out_stride, mask_lanes):
    W = x_ref.shape[3]
    Rc = ps * (Pb - 1) + pk                       # conv rows needed per band

    # Hoisted once per kernel invocation (reused by every band / channel).
    row_id = lax.broadcasted_iota(jnp.int32, (Pb, W), 0)
    if mask_lanes:
        lane_id = lax.broadcasted_iota(jnp.int32, (Pb, W), 1)
        lane_ok = jnp.logical_and(lane_id % out_stride == 0,
                                  lane_id < out_stride * PW)

    for band in range(n_bands):
        r0 = ps * Pb * band                        # first input row of the band
        rows = min(Rc, Hp_in - (KH - 1) - r0)      # static clamp for last band

        # ---- conv accumulation: all OC channels of this band at once ----
        accs = [None] * OC
        for c in range(C):
            for di in range(KH):
                base = x_ref[0, c, r0 + di:r0 + di + rows, :]        # (rows, W)
                for dj in range(KW):
                    tap = _roll_left(base, dj * L, W)                # XLU roll
                    for k in range(OC):
                        w = w_ref[((k * C + c) * KH + di) * KW + dj]  # SMEM scalar
                        t = w * tap
                        accs[k] = t if accs[k] is None else accs[k] + t

        # ---- bias + ReLU + fused MaxPool + valid-region mask + store ----
        for k in range(OC):
            a = jnp.maximum(accs[k] + b_ref[k], 0.0)                 # (rows, W)
            if pk == 1 and ps == 1:                                  # no pooling
                if rows < Pb:
                    a = jnp.concatenate(
                        [a, jnp.zeros((Pb - rows, W), jnp.float32)], axis=0)
                vals = a
            else:
                # window max along W (valid cols live at lane stride L; output
                # cols stay at lane stride ps*L -- no lane compaction needed)
                mw = a
                for pj in range(1, pk):
                    mw = jnp.maximum(mw, _roll_left(a, pj * L, W))
                # window max + stride-ps downsample along H via strided reads
                scr_ref[0:rows, :] = mw
                vals = scr_ref[pl.ds(0, Pb, stride=ps), :]
                for pi in range(1, pk):
                    vals = jnp.maximum(vals, scr_ref[pl.ds(pi, Pb, stride=ps), :])

            vrows = PH - band * Pb                 # valid output rows in band
            if vrows < Pb or mask_lanes:
                m = row_id < min(vrows, Pb)
                if mask_lanes:
                    m = jnp.logical_and(m, lane_ok)
                vals = jnp.where(m, vals, 0.0)
            o_ref[0, k, band * Pb:(band + 1) * Pb, :] = vals


def conv_relu_pool(x, w_flat, b, *, C, OC, KH, KW, valid_h, valid_w,
                   lane_stride, pool, band_rows=16, mask_lanes=False):
    """One fused Conv2d(valid, stride 1) + bias + ReLU (+ MaxPool2d) stage.

    x: (N, C, Hp, 128) f32.  Valid data: rows [0, valid_h), column j stored at
    lane j * lane_stride.  Returns (out, valid_h_out, valid_w_out, lane_stride_out)
    with out: (N, OC, H_pad, 128) f32 and invalid rows zeroed.
    """
    N, Cin, Hp, W = x.shape
    assert Cin == C and W == LANES and Hp % 8 == 0
    OH, OW = valid_h - KH + 1, valid_w - KW + 1
    pk, ps = (1, 1) if pool is None else pool
    PH, PW = (OH - pk) // ps + 1, (OW - pk) // ps + 1
    out_stride = lane_stride * ps
    assert lane_stride * (valid_w - 1) <= W - 1      # valid taps never wrap

    Pb = band_rows
    n_bands = (PH + Pb - 1) // Pb
    H_pad = n_bands * Pb
    Rc = ps * (Pb - 1) + pk
    # Every band must be able to compute all of its *valid* pooled rows.
    for band in range(n_bands):
        rows = min(Rc, Hp - (KH - 1) - ps * Pb * band)
        q_max = min(PH, (band + 1) * Pb) - 1 - band * Pb
        assert ps * q_max + pk - 1 <= rows - 1, (band, rows, q_max)

    kernel = functools.partial(
        _conv_relu_pool_kernel, C=C, OC=OC, KH=KH, KW=KW, L=lane_stride,
        pk=pk, ps=ps, Pb=Pb, n_bands=n_bands, Hp_in=Hp, PH=PH, PW=PW,
        out_stride=out_stride, mask_lanes=mask_lanes)

    out = pl.pallas_call(
        kernel,
        out_shape=jax.ShapeDtypeStruct((N, OC, H_pad, W), jnp.float32),
        grid=(N,),
        in_specs=[
            pl.BlockSpec(memory_space=pltpu.MemorySpace.SMEM),    # flat conv weights
            pl.BlockSpec(memory_space=pltpu.MemorySpace.SMEM),    # bias
            pl.BlockSpec((1, C, Hp, W), lambda n: (n, 0, 0, 0)),
        ],
        out_specs=pl.BlockSpec((1, OC, H_pad, W), lambda n: (n, 0, 0, 0)),
        scratch_shapes=[pltpu.VMEM((_round_up(Rc, 8), W), jnp.float32)],
        compiler_params=pltpu.CompilerParams(
            dimension_semantics=("parallel",)),
    )(w_flat, b, x)
    return out, PH, PW, out_stride


# ---------------------------------------------------------------------------
# Fused fc1 -> ReLU -> fc2 -> ReLU -> (dropout: identity) -> fc3 -> sigmoid.
# fc1's weight is pre-padded at init to the conv3 output layout; weights bf16,
# f32 accumulation / f32 epilogue.
# ---------------------------------------------------------------------------

def _mlp_kernel(x_ref, w1_ref, b1_ref, w2_ref, b2_ref, w3_ref, b3_ref, o_ref):
    h = jnp.dot(x_ref[...].astype(jnp.bfloat16), w1_ref[...],
                preferred_element_type=jnp.float32)
    h = jnp.maximum(h + b1_ref[...], 0.0)
    h = jnp.dot(h.astype(jnp.bfloat16), w2_ref[...],
                preferred_element_type=jnp.float32)
    h = jnp.maximum(h + b2_ref[...], 0.0)
    # TODO(synk): nn.Dropout(p=0.3) is stochastic; implemented as eval-mode identity.
    h = jnp.dot(h.astype(jnp.bfloat16), w3_ref[...],
                preferred_element_type=jnp.float32)
    o_ref[...] = jax.nn.sigmoid(h + b3_ref[...]).astype(o_ref.dtype)


def mlp_head(x, w1, b1, w2, b2, w3, b3):
    N, K1 = x.shape
    H1, H2, NC = w1.shape[1], w2.shape[1], w3.shape[1]
    return pl.pallas_call(
        _mlp_kernel,
        out_shape=jax.ShapeDtypeStruct((N, NC), jnp.float32),
        grid=(1,),
        in_specs=[
            pl.BlockSpec((N, K1), lambda i: (0, 0)),
            pl.BlockSpec((K1, H1), lambda i: (0, 0)),
            pl.BlockSpec((1, H1), lambda i: (0, 0)),
            pl.BlockSpec((H1, H2), lambda i: (0, 0)),
            pl.BlockSpec((1, H2), lambda i: (0, 0)),
            pl.BlockSpec((H2, NC), lambda i: (0, 0)),
            pl.BlockSpec((1, NC), lambda i: (0, 0)),
        ],
        out_specs=pl.BlockSpec((N, NC), lambda i: (0, 0)),
        compiler_params=pltpu.CompilerParams(
            vmem_limit_bytes=48 * 1024 * 1024),
    )(x, w1, b1, w2, b2, w3, b3)


# ---------------------------------------------------------------------------
# CNN2 parameters + forward
# ---------------------------------------------------------------------------

# Geometry of the conv3 output produced by the Pallas conv stack:
#   (N, 12, 32, 128) f32, with the PyTorch (12, 26, 26) feature (c, y, x)
#   stored at [c, y, 4*x]  (lane stride 4 after two stride-2 pools).
_CONV3_OC, _CONV3_HP, _CONV3_VALID, _CONV3_LANE_STRIDE = 12, 32, 26, 4


def init_params(key, num_classes=14):
    ks = jax.random.split(key, 12)

    def norm(k, shape, scale=0.05):
        return scale * jax.random.normal(k, shape, jnp.float32)

    raw = {
        "conv1_w": norm(ks[0], (6, 3, 4, 4)),    "conv1_b": norm(ks[1], (6,)),
        "conv2_w": norm(ks[2], (6, 6, 4, 4)),    "conv2_b": norm(ks[3], (6,)),
        "conv3_w": norm(ks[4], (12, 6, 4, 4)),   "conv3_b": norm(ks[5], (12,)),
        "fc1_w": norm(ks[6], (64, 8112)),        "fc1_b": norm(ks[7], (64,)),
        "fc2_w": norm(ks[8], (32, 64)),          "fc2_b": norm(ks[9], (32,)),
        "fc3_w": norm(ks[10], (num_classes, 32)),
        "fc3_b": norm(ks[11], (num_classes,)),
    }

    # Scatter fc1's (in -> out) weights once, at init, into the zero-padded
    # layout of the Pallas conv3 output: no activation relayout ever happens.
    v, s = _CONV3_VALID, _CONV3_LANE_STRIDE
    w1t = raw["fc1_w"].T.reshape(_CONV3_OC, v, v, 64)           # (c, y, x, out)
    w1p = jnp.zeros((_CONV3_OC, _CONV3_HP, LANES, 64), jnp.float32)
    w1p = w1p.at[:, :v, 0:s * v:s, :].set(w1t)
    w1p = w1p.reshape(_CONV3_OC * _CONV3_HP * LANES, 64)

    params = {
        # conv weights flattened in (oc, c, kh, kw) order for SMEM scalar reads
        "conv1_w": raw["conv1_w"].reshape(-1), "conv1_b": raw["conv1_b"],
        "conv2_w": raw["conv2_w"].reshape(-1), "conv2_b": raw["conv2_b"],
        "conv3_w": raw["conv3_w"].reshape(-1), "conv3_b": raw["conv3_b"],
        # fc weights pre-transposed (fc1 zero-padded) at init, stored bf16
        "fc1_w": w1p.astype(jnp.bfloat16),
        "fc1_b": raw["fc1_b"].reshape(1, -1),
        "fc2_w": raw["fc2_w"].T.astype(jnp.bfloat16),
        "fc2_b": raw["fc2_b"].reshape(1, -1),
        "fc3_w": raw["fc3_w"].T.astype(jnp.bfloat16),
        "fc3_b": raw["fc3_b"].reshape(1, -1),
    }
    return params, raw


def cnn2_forward(params, x, dropout=False):
    N, C, H, W = x.shape
    assert (C, H, W) == (3, 128, 128)  # nn.Linear(8112, 64) implies 128x128 input

    a, vh, vw, ls = conv_relu_pool(x, params["conv1_w"], params["conv1_b"],
                                   C=3, OC=6, KH=4, KW=4,
                                   valid_h=128, valid_w=128,
                                   lane_stride=1, pool=(3, 2))
    a, vh, vw, ls = conv_relu_pool(a, params["conv2_w"], params["conv2_b"],
                                   C=6, OC=6, KH=4, KW=4,
                                   valid_h=vh, valid_w=vw,
                                   lane_stride=ls, pool=(2, 2))
    a, vh, vw, ls = conv_relu_pool(a, params["conv3_w"], params["conv3_b"],
                                   C=6, OC=12, KH=4, KW=4,
                                   valid_h=vh, valid_w=vw,
                                   lane_stride=ls, pool=None, mask_lanes=True)
    assert a.shape == (N, _CONV3_OC, _CONV3_HP, LANES)
    assert (vh, vw, ls) == (_CONV3_VALID, _CONV3_VALID, _CONV3_LANE_STRIDE)
    # torch.flatten(x, 1): conv3's padded output already matches the zero-padded
    # fc1 weight layout, so the flatten is a free contiguous reshape.
    flat = a.reshape(N, _CONV3_OC * _CONV3_HP * LANES)
    return mlp_head(flat, params["fc1_w"], params["fc1_b"],
                    params["fc2_w"], params["fc2_b"],
                    params["fc3_w"], params["fc3_b"])


# ---------------------------------------------------------------------------
# Pure-JAX f32 reference (tolerance check only).
# ---------------------------------------------------------------------------

def reference_forward(raw, x):
    def conv(x, w, b):
        y = lax.conv_general_dilated(
            x, w, window_strides=(1, 1), padding="VALID",
            dimension_numbers=("NCHW", "OIHW", "NCHW"),
            precision=lax.Precision.HIGHEST)
        return jax.nn.relu(y + b[None, :, None, None])

    def pool(x, k, s):
        return lax.reduce_window(x, -jnp.inf, lax.max,
                                 (1, 1, k, k), (1, 1, s, s), "VALID")

    x = pool(conv(x, raw["conv1_w"], raw["conv1_b"]), 3, 2)
    x = pool(conv(x, raw["conv2_w"], raw["conv2_b"]), 2, 2)
    x = conv(x, raw["conv3_w"], raw["conv3_b"])
    x = x.reshape(x.shape[0], -1)
    x = jax.nn.relu(x @ raw["fc1_w"].T + raw["fc1_b"])
    x = jax.nn.relu(x @ raw["fc2_w"].T + raw["fc2_b"])
    return jax.nn.sigmoid(x @ raw["fc3_w"].T + raw["fc3_b"])


if __name__ == "__main__":
    _roll_is_like_jnp()   # run the roll-direction probe eagerly (cached)

    key = jax.random.PRNGKey(0)
    pkey, xkey = jax.random.split(key)
    params, raw = init_params(pkey, num_classes=14)
    x = jax.random.normal(xkey, (2, 3, 128, 128), jnp.float32)

    fwd = jax.jit(functools.partial(cnn2_forward, dropout=False))
    out = fwd(params, x)
    jax.block_until_ready(out)

    assert out.shape == (2, 14), out.shape
    assert bool(jnp.all(jnp.isfinite(out)))
    assert bool(jnp.all((out >= 0.0) & (out <= 1.0)))

    # Tolerance check vs. f32 reference (bf16 fc weights give ~1e-3 level drift).
    ref = jax.jit(reference_forward)(raw, x)
    max_err = float(jnp.max(jnp.abs(out - ref)))
    assert max_err < 2e-2, f"max abs error vs reference: {max_err}"

    print("KERNEL_OK")
</pallas_src>

<mosaic_0001>
module attributes {stable_mosaic.version = 11 : i64} {
  func.func @kernel(%arg0: memref<8x128xf32, #tpu.memory_space<vmem>>, %arg1: memref<8x128xf32, #tpu.memory_space<vmem>>) attributes {dimension_semantics = [], scalar_prefetch = 0 : i64, scratch_operands = 0 : i64, tpu.core_type = #tpu.core_type<tc>} {
    %c0 = arith.constant 0 : index
    %c0_0 = arith.constant 0 : index
    %0 = vector.load %arg0[%c0, %c0_0] : memref<8x128xf32, #tpu.memory_space<vmem>>, vector<8x128xf32>
    %c3_i32 = arith.constant 3 : i32
    %1 = tpu.dynamic_rotate %0 by %c3_i32 dim 1 : vector<8x128xf32>, i32 -> vector<8x128xf32>
    %c0_1 = arith.constant 0 : index
    %c0_2 = arith.constant 0 : index
    %2 = vector.load %arg1[%c0_1, %c0_2] : memref<8x128xf32, #tpu.memory_space<vmem>>, vector<8x128xf32>
    tpu.vector_store %arg1[%c0_1, %c0_2], %1 {strides = array<i32>} : memref<8x128xf32, #tpu.memory_space<vmem>>, vector<8x128xf32>,
    return
  }
}

</mosaic_0001>

<bundles_post_ra>
// kernel: tpu_custom_call.1
= control target key start
LH: loop header
LB: loop body
LE: loop exit
PB: predicated region body
PF: predicated region fallthrough
CT: control target
= control target key end

     0   :  { %6 = vsyncpa [#allocation3], 0  ;;  %s128_s0 = inlined_call_operand.hbm [shape: f32[8,128], index: 0, kind: input, shape index: {}]   ;;  %s129_s1 = inlined_call_operand.hbm [shape: f32[8,128], index: 1, kind: output, shape index: {}]  }
   0x1   :  { %7 = vsyncpa [#allocation4], 0  ;;  %s91_s6 = smov [#allocation2]   ;;  %s43_s10 = scalar_lea.hbm %s128_s0, 128 }
   0x2   :  { %s14_s7 = sshll.u32 %s91_s6, 4  ;;  %p44_p0 = scmp.ne.s32.totalorder %s128_s0, %s43_s10  ;;  %s15_s7 = int_to_ptr.vmem [resolvable:$true] %s14_s7 }
   0x3   :  { %p47_p1 = scmp.lt.u32.totalorder %s43_s10, %s128_s0 }
   0x5   :  { %p49_p2 = pnand %p47_p1, %p44_p0 }
   0x7   :  { %52 = shalt.err (!%p49_p2)
}
   0x8   :  { %s53_s15 = scalar_lea.vmem %s15_s7, 128  ;;  %p58_p4 = scmp.lt.s32.totalorder %s15_s7, %s15_s7 }
   0x9   :  { %p54_p3 = scmp.ne.s32.totalorder %s15_s7, %s53_s15  ;;  %p59_p5 = scmp.lt.s32.totalorder %s53_s15, %s53_s15 }
   0xb   :  { %p60_p6 = por %p59_p5, %p58_p4 }
   0xd   :  { %p61_p7 = pnand %p60_p6, %p54_p3 }
   0xf   :  { %64 = shalt.err (!%p61_p7)
}
  0x10   :  { %17 = dma.hbm_to_vmem [thread:$0]  %s128_s0, 128, %s15_s7, [#allocation3]  }
  0x11   :  { %87 = dma.done.wait [#allocation3], 128  }
  0x12   :  { %88 = vsyncadd [#allocation3], 4294967168  ;;  %v21_v0 = vld [vmem:[#allocation2] sm:$0xff]  ;;  %s92_s18 = smov 3   ;;  %s93_s19 = smov [#allocation5]  }
  0x13   :  { %22 = vrot.lane.b32.xlu0 %v21_v0, %s92_s18  ;;  %s31_s20 = sshll.u32 %s93_s19, 4  ;;  %s32_s20 = int_to_ptr.vmem [resolvable:$true] %s31_s20 }
  0x14   :  { %s65_s21 = scalar_lea.vmem %s32_s20, 128  ;;  %p70_p9 = scmp.lt.s32.totalorder %s32_s20, %s32_s20 }
  0x15   :  { %p66_p8 = scmp.ne.s32.totalorder %s32_s20, %s65_s21  ;;  %p71_p10 = scmp.lt.s32.totalorder %s65_s21, %s65_s21 }
  0x17   :  { %p72_p11 = por %p71_p10, %p70_p9 }
  0x19   :  { %p73_p12 = pnand %p72_p11, %p66_p8 }
  0x85   :  { %v23_v1 = vpop.permute.xlu0 %22 }
  0x86   :  { %24 = vst [vmem:[#allocation5] sm:$0xff] %v23_v1 }
  0x87   :  { %76 = shalt.err (!%p73_p12)
}
  0x88   :  { %s77_s0 = scalar_lea.hbm %s129_s1, 128 }
  0x89   :  { %p78_p13 = scmp.ne.s32.totalorder %s129_s1, %s77_s0  ;;  %p81_p0 = scmp.lt.u32.totalorder %s77_s0, %s129_s1 }
  0x8b   :  { %p83_p1 = pnand %p81_p0, %p78_p13 }
  0x8d   :  { %86 = shalt.err (!%p83_p1)
}
  0x8e   :  { %34 = dma.vmem_to_hbm [thread:$0]  %s32_s20, 128, %s129_s1, [#allocation4]  }
  0x8f   :  { %89 = dma.done.wait [#allocation4], 128  }
  0x90   :  { %90 = vsyncadd [#allocation4], 4294967168 }
  0x91   :  { %38 = vsyncpa [#allocation3], 1 }
  0x92   :  { %39 = vsyncpa [#allocation4], 1 }

</bundles_post_ra>
